<compile_context>
chip_gen: v5e
topology: v5e:2x2
jax: 0.10.0
libtpu: 0.0.40
codegen_flags: <defaults>
</compile_context>

<pallas_src>
import functools

import jax
import jax.numpy as jnp
from jax import lax
from jax.experimental import pallas as pl
from jax.experimental.pallas import tpu as pltpu


# -----------------------------------------------------------------------------
# helpers
# -----------------------------------------------------------------------------
def _round_up(x, m):
    return ((x + m - 1) // m) * m


def _vmem_limit_bytes():
    # Generation-aware VMEM budget: ~80% of physical VMEM (~100 MiB on
    # v5e/v6e, ~51 MiB on v7x) instead of a hard-coded 64 MiB cap.
    try:
        return int(0.8 * pltpu.get_tpu_info().vmem_capacity_bytes)
    except Exception:
        return 64 * 1024 * 1024


_VMEM_LIMIT = _vmem_limit_bytes()


# -----------------------------------------------------------------------------
# Pallas kernel: fused  y = act(X @ W + b)  -- the compute core of every conv3d
# -----------------------------------------------------------------------------
def _gemm_bias_act_kernel(x_ref, w_ref, b_ref, o_ref, acc_ref, *, relu):
    # x_ref  : (tm, tk) bf16   activation tile
    # w_ref  : (tk, tn) bf16   weight tile (streamed)
    # b_ref  : (1,  tn) f32    bias tile
    # o_ref  : (tm, tn) bf16   output tile
    # acc_ref: (tm, tn) f32    K-reduction accumulator (grid axis 2 "arbitrary")
    k = pl.program_id(2)

    @pl.when(k == 0)
    def _():
        acc_ref[...] = jnp.zeros_like(acc_ref)

    acc_ref[...] += jnp.dot(x_ref[...], w_ref[...],
                            preferred_element_type=jnp.float32)   # MXU, f32 acc

    @pl.when(k == pl.num_programs(2) - 1)
    def _():
        y = acc_ref[...] + b_ref[...]          # exact f32 bias add
        if relu:
            y = jnp.maximum(y, 0.0)
        o_ref[...] = y.astype(o_ref.dtype)     # bf16 writeback (half the bytes)


def gemm_bias_act(x, w, b, *, relu, out_dtype=jnp.bfloat16, tm_max=512):
    """Fused y = act(x @ w + b).  x:(M,K) bf16, w:(K,N) bf16, b:(N,) f32."""
    M, K = x.shape
    K2, N = w.shape
    assert K2 == K and b.shape == (N,)

    if x.dtype != jnp.bfloat16:      # no-op for the normal bf16 path
        x = x.astype(jnp.bfloat16)
    if w.dtype != jnp.bfloat16:
        w = w.astype(jnp.bfloat16)

    # --- tile selection --------------------------------------------------------
    # N: lane-aligned 128-wide tiles when possible; small Cout uses the full
    #    (tiny) extent, never a forced huge resident block.
    tn = 128 if (N % 128 == 0 and N > 128) else N
    # K: full-K for small / unaligned K; K-tiled accumulator path for large K
    #    (keeps VMEM flat within v7x's 64 MiB).
    tk = 512 if (K % 512 == 0 and K > 2048) else K
    # M: large tiles amortize the per-row-tile re-fetch of W; multiples of 16
    #    for bf16 sublane packing.
    tm = min(tm_max, _round_up(M, 16))
    Mp = _round_up(M, tm)
    if Mp != M:
        x = jnp.pad(x, ((0, Mp - M), (0, 0)))

    b2 = b.reshape(1, N).astype(jnp.float32)
    grid = (Mp // tm, N // tn, K // tk)

    cost = pl.CostEstimate(
        flops=2 * Mp * K * N,
        transcendentals=0,
        bytes_accessed=int(Mp * K * 2 + K * N * 2 + N * 4
                           + Mp * N * jnp.dtype(out_dtype).itemsize),
    )

    out = pl.pallas_call(
        functools.partial(_gemm_bias_act_kernel, relu=relu),
        out_shape=jax.ShapeDtypeStruct((Mp, N), out_dtype),
        grid_spec=pltpu.PrefetchScalarGridSpec(
            num_scalar_prefetch=0,
            grid=grid,
            in_specs=[
                pl.BlockSpec((tm, tk), lambda i, j, k: (i, k)),   # activations
                pl.BlockSpec((tk, tn), lambda i, j, k: (k, j)),   # weights
                pl.BlockSpec((1, tn), lambda i, j, k: (0, j)),    # bias
            ],
            out_specs=pl.BlockSpec((tm, tn), lambda i, j, k: (i, j)),
            scratch_shapes=[pltpu.VMEM((tm, tn), jnp.float32)],
        ),
        compiler_params=pltpu.CompilerParams(
            dimension_semantics=("parallel", "parallel", "arbitrary"),
            vmem_limit_bytes=_VMEM_LIMIT,
        ),
        cost_estimate=cost,
    )(x, w, b2)

    return out[:M] if Mp != M else out


# -----------------------------------------------------------------------------
# conv3d (k=3, stride 1, 'same') = im2col (XLA) + fused Pallas GEMM
# -----------------------------------------------------------------------------
def conv3d_same(x, w_mat, b, *, relu):
    """x: (N, D, H, W, Cin) bf16; w_mat: (27*Cin, Cout) bf16; b: (Cout,) f32."""
    # TODO(synk): fold the patch extraction into the kernel (tap-accumulating
    #             DMAs) to avoid materializing the 27x im2col tensor in HBM.
    n, d, h, w, cin = x.shape
    xp = jnp.pad(x, ((0, 0), (1, 1), (1, 1), (1, 1), (0, 0)))
    cols = [xp[:, kd:kd + d, kh:kh + h, kw:kw + w, :]
            for kd in range(3) for kh in range(3) for kw in range(3)]
    patches = jnp.concatenate(cols, axis=-1).reshape(n * d * h * w, 27 * cin)
    cout = w_mat.shape[1]
    y = gemm_bias_act(patches, w_mat, b, relu=relu)
    return y.reshape(n, d, h, w, cout)


def max_pool_2x(x):
    n, d, h, w, c = x.shape
    return x.reshape(n, d // 2, 2, h // 2, 2, w // 2, 2, c).max(axis=(2, 4, 6))


def upsample_nearest(x, out_size):
    n, d, h, w, c = x.shape
    fd, fh, fw = out_size[0] // d, out_size[1] // h, out_size[2] // w
    assert (fd * d, fh * h, fw * w) == tuple(out_size)
    if fd > 1:
        x = jnp.repeat(x, fd, axis=1)
    if fh > 1:
        x = jnp.repeat(x, fh, axis=2)
    if fw > 1:
        x = jnp.repeat(x, fw, axis=3)
    return x


# -----------------------------------------------------------------------------
# LocalNet parameters + forward
# -----------------------------------------------------------------------------
def _conv_params(key, cin, cout):
    k_w, k_b = jax.random.split(key)
    fan_in = 27 * cin
    w = jax.random.normal(k_w, (fan_in, cout), jnp.float32) / jnp.sqrt(fan_in)
    b = jax.random.normal(k_b, (cout,), jnp.float32) * 0.01
    # Weights stored once in bf16 im2col layout (no per-call wrapper casts);
    # bias kept in f32 for an exact add inside the kernel.
    return {"w": w.astype(jnp.bfloat16), "b": b}


def init_localnet(key, input_channel=2, num_features=32):
    nc = [num_features * 2 ** i for i in range(5)]
    ks = iter(jax.random.split(key, 14))
    down_io = [(input_channel, nc[0]), (nc[0], nc[1]),
               (nc[1], nc[2]), (nc[2], nc[3])]
    up_io = [(nc[4], nc[3]), (nc[3], nc[2]), (nc[2], nc[1]), (nc[1], nc[0])]
    ddf_in = [nc[4], nc[3], nc[2], nc[1], nc[0]]      # nc[4 - i] for ddf_levels
    return {
        "down": [_conv_params(next(ks), i, o) for i, o in down_io],
        "bottleneck": _conv_params(next(ks), nc[3], nc[4]),
        "up": [_conv_params(next(ks), i, o) for i, o in up_io],
        "ddf": [_conv_params(next(ks), i, 3) for i in ddf_in],
    }


def calc_upsample_layer_output_size(input_shape, num_downsample_layers=4):
    sizes = [tuple(s // 2 ** i for s in input_shape)
             for i in range(num_downsample_layers)]
    return sizes[::-1]


def localnet_forward(params, x, *, input_shape):
    """x: (N, C, D, H, W) f32 -> (f_bottleneck, ddf), both NCDHW f32."""
    # channels-last puts channels on TPU lanes; single bf16 activation stream.
    f = jnp.transpose(x, (0, 2, 3, 4, 1)).astype(jnp.bfloat16)

    # ---- encoder: DownsampleBlock x4 ----------------------------------------
    skips = []
    for p in params["down"]:
        s = conv3d_same(f, p["w"], p["b"], relu=True)
        skips.append(s)
        f = max_pool_2x(s)
    f_jc0, f_jc1, f_jc2, f_jc3 = skips

    # ---- bottleneck Conv3dBlock ----------------------------------------------
    f_bottleneck = conv3d_same(f, params["bottleneck"]["w"],
                               params["bottleneck"]["b"], relu=True)

    # ---- decoder: UpSampleBlock x4 (upsample -> conv -> + skip) ---------------
    up_sizes = calc_upsample_layer_output_size(input_shape, 4)
    f_prev = f_bottleneck
    f_ups = []
    for p, skip, sz in zip(params["up"], [f_jc3, f_jc2, f_jc1, f_jc0], up_sizes):
        u = upsample_nearest(f_prev, sz)
        u = conv3d_same(u, p["w"], p["b"], relu=True)
        f_prev = u + skip
        f_ups.append(f_prev)

    # ---- DDFFusion heads: conv -> 3ch, resize to input_shape, sum -------------
    ddf = None
    for p, feat in zip(params["ddf"], [f_bottleneck] + f_ups):
        d3 = conv3d_same(feat, p["w"], p["b"], relu=False)
        d3 = upsample_nearest(d3, input_shape).astype(jnp.float32)
        ddf = d3 if ddf is None else ddf + d3

    f_bottleneck_out = jnp.transpose(f_bottleneck.astype(jnp.float32),
                                     (0, 4, 1, 2, 3))
    ddf_out = jnp.transpose(ddf, (0, 4, 1, 2, 3))
    return f_bottleneck_out, ddf_out


# -----------------------------------------------------------------------------
# main
# -----------------------------------------------------------------------------
if __name__ == "__main__":
    # Small shapes consistent with the module: batch=2, 2 input channels,
    # 16^3 volume, num_features=4  ->  channel widths [4, 8, 16, 32, 64].
    input_shape = (16, 16, 16)
    batch, in_ch, num_features = 2, 2, 4

    key = jax.random.PRNGKey(0)
    k_par, k_x, k_t = jax.random.split(key, 3)
    params = init_localnet(k_par, input_channel=in_ch, num_features=num_features)
    x = jax.random.normal(k_x, (batch, in_ch) + input_shape, dtype=jnp.float32)

    # --- sanity check 1: fused GEMM kernel vs jnp reference (same numerics) ----
    ka, kw_, kb_ = jax.random.split(k_t, 3)
    a = jax.random.normal(ka, (200, 300), jnp.float32).astype(jnp.bfloat16)
    wm = (jax.random.normal(kw_, (300, 96), jnp.float32) * 0.1).astype(jnp.bfloat16)
    bb = jax.random.normal(kb_, (96,), jnp.float32) * 0.01
    got = gemm_bias_act(a, wm, bb, relu=True).astype(jnp.float32)
    ref = jnp.maximum(jnp.dot(a, wm, preferred_element_type=jnp.float32) + bb, 0.0)
    assert jnp.allclose(got, ref, atol=2e-2, rtol=2e-2), "GEMM kernel mismatch"

    # --- sanity check 2: Pallas conv3d vs lax.conv_general_dilated -------------
    p0 = params["down"][0]
    x_cl = jnp.transpose(x, (0, 2, 3, 4, 1)).astype(jnp.bfloat16)
    got_c = conv3d_same(x_cl, p0["w"], p0["b"], relu=True).astype(jnp.float32)
    w5 = p0["w"].reshape(3, 3, 3, in_ch, num_features)
    ref_c = lax.conv_general_dilated(
        x_cl, w5, window_strides=(1, 1, 1), padding="SAME",
        dimension_numbers=("NDHWC", "DHWIO", "NDHWC"),
        preferred_element_type=jnp.float32)
    ref_c = jnp.maximum(ref_c + p0["b"], 0.0)
    assert jnp.allclose(got_c, ref_c, atol=5e-2, rtol=5e-2), "conv3d mismatch"

    # --- full LocalNet forward --------------------------------------------------
    fwd = jax.jit(localnet_forward, static_argnames=("input_shape",))
    f_bottleneck, ddf = fwd(params, x, input_shape=input_shape)
    f_bottleneck, ddf = jax.block_until_ready((f_bottleneck, ddf))

    nc4 = num_features * 2 ** 4
    assert f_bottleneck.shape == (batch, nc4, 1, 1, 1)
    assert ddf.shape == (batch, 3) + input_shape
    assert bool(jnp.isfinite(f_bottleneck).all()) and bool(jnp.isfinite(ddf).all())

    print("KERNEL_OK")
</pallas_src>

<mosaic_0001>
module attributes {stable_mosaic.version = 11 : i64} {
  func.func @_gemm_bias_act_kernel(%arg0: i32, %arg1: i32, %arg2: i32, %arg3: memref<208x300xbf16, #tpu.memory_space<vmem>>, %arg4: memref<300x96xbf16, #tpu.memory_space<vmem>>, %arg5: memref<1x96xf32, #tpu.memory_space<vmem>>, %arg6: memref<208x96xbf16, #tpu.memory_space<vmem>>, %arg7: memref<208x96xf32, #tpu.memory_space<vmem>>) attributes {dimension_semantics = [#tpu.dimension_semantics<parallel>, #tpu.dimension_semantics<parallel>, #tpu.dimension_semantics<arbitrary>], iteration_bounds = array<i64: 1, 1, 1>, scalar_prefetch = 0 : i64, scratch_operands = 1 : i64, tpu.core_type = #tpu.core_type<tc>, window_params = [{transform_indices = @transform_0, window_bounds = array<i64: 208, 300>}, {transform_indices = @transform_1, window_bounds = array<i64: 300, 96>}, {transform_indices = @transform_2, window_bounds = array<i64: 1, 96>}, {transform_indices = @transform_3, window_bounds = array<i64: 208, 96>}]} {
    %c0_i32 = arith.constant 0 : i32
    %0 = arith.cmpi eq, %arg2, %c0_i32 : i32
    %1 = arith.extui %0 : i1 to i32
    %c0_i32_0 = arith.constant 0 : i32
    %2 = arith.cmpi ne, %1, %c0_i32_0 : i32
    scf.if %2 {
      %cst_10 = arith.constant 0.000000e+00 : f32
      %12 = vector.broadcast %cst_10 : f32 to vector<208x96xf32>
      %c0_11 = arith.constant 0 : index
      %c0_12 = arith.constant 0 : index
      %13 = vector.load %arg7[%c0_11, %c0_12] : memref<208x96xf32, #tpu.memory_space<vmem>>, vector<208x96xf32>
      tpu.vector_store %arg7[%c0_11, %c0_12], %12 {strides = array<i32>} : memref<208x96xf32, #tpu.memory_space<vmem>>, vector<208x96xf32>,
    } else {
    }
    %c0 = arith.constant 0 : index
    %c0_1 = arith.constant 0 : index
    %3 = vector.load %arg7[%c0, %c0_1] : memref<208x96xf32, #tpu.memory_space<vmem>>, vector<208x96xf32>
    %c0_2 = arith.constant 0 : index
    %c0_3 = arith.constant 0 : index
    %4 = vector.load %arg3[%c0_2, %c0_3] : memref<208x300xbf16, #tpu.memory_space<vmem>>, vector<208x300xbf16>
    %c0_4 = arith.constant 0 : index
    %c0_5 = arith.constant 0 : index
    %5 = vector.load %arg4[%c0_4, %c0_5] : memref<300x96xbf16, #tpu.memory_space<vmem>>, vector<300x96xbf16>
    %cst = arith.constant dense<0.000000e+00> : vector<208x96xf32>
    %6 = tpu.matmul %4, %5, %cst {dimension_numbers = #tpu.dot_dimension_numbers<[1], [0], [0], [1], [0, 0, 1, 1], [], []>} : vector<208x300xbf16>, vector<300x96xbf16>, vector<208x96xf32> -> vector<208x96xf32>
    %7 = arith.addf %3, %6 : vector<208x96xf32>
    %c0_6 = arith.constant 0 : index
    %c0_7 = arith.constant 0 : index
    %8 = vector.load %arg7[%c0_6, %c0_7] : memref<208x96xf32, #tpu.memory_space<vmem>>, vector<208x96xf32>
    tpu.vector_store %arg7[%c0_6, %c0_7], %7 {strides = array<i32>} : memref<208x96xf32, #tpu.memory_space<vmem>>, vector<208x96xf32>,
    %c0_i32_8 = arith.constant 0 : i32
    %9 = arith.cmpi eq, %arg2, %c0_i32_8 : i32
    %10 = arith.extui %9 : i1 to i32
    %c0_i32_9 = arith.constant 0 : i32
    %11 = arith.cmpi ne, %10, %c0_i32_9 : i32
    scf.if %11 {
      %c0_10 = arith.constant 0 : index
      %c0_11 = arith.constant 0 : index
      %12 = vector.load %arg7[%c0_10, %c0_11] : memref<208x96xf32, #tpu.memory_space<vmem>>, vector<208x96xf32>
      %c0_12 = arith.constant 0 : index
      %c0_13 = arith.constant 0 : index
      %13 = vector.load %arg5[%c0_12, %c0_13] : memref<1x96xf32, #tpu.memory_space<vmem>>, vector<1x96xf32>
      %14 = vector.broadcast %13 : vector<1x96xf32> to vector<208x96xf32>
      %15 = arith.addf %12, %14 : vector<208x96xf32>
      %cst_14 = arith.constant 0.000000e+00 : f32
      %16 = vector.broadcast %cst_14 : f32 to vector<208x96xf32>
      %17 = arith.maximumf %15, %16 : vector<208x96xf32>
      %18 = arith.truncf %17 : vector<208x96xf32> to vector<208x96xbf16>
      %c0_15 = arith.constant 0 : index
      %c0_16 = arith.constant 0 : index
      %19 = vector.load %arg6[%c0_15, %c0_16] : memref<208x96xbf16, #tpu.memory_space<vmem>>, vector<208x96xbf16>
      tpu.vector_store %arg6[%c0_15, %c0_16], %18 {strides = array<i32>} : memref<208x96xbf16, #tpu.memory_space<vmem>>, vector<208x96xbf16>,
    } else {
    }
    return
  }
  func.func @transform_0(%arg0: i32, %arg1: i32, %arg2: i32) -> (i32, i32) {
    %c0_i32 = arith.constant 0 : i32
    return %arg0, %arg2 : i32, i32
  }
  func.func @transform_1(%arg0: i32, %arg1: i32, %arg2: i32) -> (i32, i32) {
    %c0_i32 = arith.constant 0 : i32
    return %arg2, %arg1 : i32, i32
  }
  func.func @transform_2(%arg0: i32, %arg1: i32, %arg2: i32) -> (i32, i32) {
    %c0_i32 = arith.constant 0 : i32
    %c0_i32_0 = arith.constant 0 : i32
    return %c0_i32, %arg1 : i32, i32
  }
  func.func @transform_3(%arg0: i32, %arg1: i32, %arg2: i32) -> (i32, i32) {
    %c0_i32 = arith.constant 0 : i32
    return %arg0, %arg1 : i32, i32
  }
}

</mosaic_0001>

<bundles_post_ra>
// kernel: tpu_custom_call.1
= control target key start
LH: loop header
LB: loop body
LE: loop exit
PB: predicated region body
PF: predicated region fallthrough
CT: control target
= control target key end

     0   :  { %vm510_vm0 = vcmask 1045504   ;;  %vm470_vm1 = vcmask 359424   ;;  %vm19_vm2 = vcmask 785408   ;;  %vm900_vm3 = vcmask 781312   ;;  %s1820_s1 = inlined_call_operand.vmem [shape: bf16[300,96], index: 1, kind: input, shape index: {}]   ;;  %s1821_s0 = inlined_call_operand.vmem [shape: bf16[208,300], index: 0, kind: input, shape index: {}]   ;;  %s1822_s2 = inlined_call_operand.vmem [shape: f32[1,96], index: 2, kind: input, shape index: {}]   ;;  %s1823_s3 = inlined_call_operand.vmem [shape: bf16[208,96], index: 3, kind: output, shape index: {}]  }
   0x1   :  { %v1222_v0 = vld [vmem:[%s1820_s1 + $0x38] sm:$0xff]  ;;  %v1161_v2 = vld [vmem:[%s1820_s1 + $0x90] sm:$0xf]  ;;  %v1233_v3 = vld [vmem:[%s1820_s1 + $0x90] sm:$0x30] }
   0x2   :  { %v1282_v1 = vld [vmem:[%s1820_s1 + $0x78] sm:$0xff]  ;;  %514 = vmatpush.bf16.msra.mxu0 %v1222_v0  ;;  %1234 = vmatpush.bf16.msra.mxu3 %v1222_v0  ;;  %v1162_v4 = vor.u32 %v1233_v3, %v1161_v2  ;;  %v1221_v5 = vld [vmem:[%s1820_s1 + $0x30] sm:$0xff]  ;;  %v1305_v8 = vld [vmem:[%s1820_s1 + $0x88] sm:$0xff] }
   0x3   :  { %588 = vmatpush.bf16.msra.mxu1 %v1282_v1  ;;  %v1297_v6 = vld [vmem:[%s1820_s1 + $0x70] sm:$0xff]  ;;  %v1220_v9 = vld [vmem:[%s1820_s1 + $0x28] sm:$0xff]  ;;  %v1318_v11 = vld [vmem:[%s1820_s1 + $0x80] sm:$0xff] }
   0x4   :  { %v1299_v7 = vsel %vm510_vm0, %v1162_v4, 0  ;;  %v1228_v10 = vld [vmem:[%s1820_s1 + $0x68] sm:$0xff]  ;;  %v1178_v13 = vld [vmem:[%s1821_s0 + $0x10] sm:$0xf0]  ;;  %v1219_v14 = vld [vmem:[%s1820_s1 + $0x20] sm:$0xff] }
   0x5   :  { %667 = vmatpush.bf16.msra.mxu2 %v1299_v7  ;;  %v941_v12 = vld [vmem:[%s1821_s0 + $0x8] sm:$0xf]  ;;  %v1227_v15 = vld [vmem:[%s1820_s1 + $0x60] sm:$0xff]  ;;  %v1218_v17 = vld [vmem:[%s1820_s1 + $0x18] sm:$0xff] }
   0x6   :  { %515 = vmatpush.bf16.msra.mxu0 %v1221_v5  ;;  %1235 = vmatpush.bf16.msra.mxu3 %v1221_v5  ;;  %v942_v16 = vor.u32 %v1178_v13, %v941_v12  ;;  %v1226_v18 = vld [vmem:[%s1820_s1 + $0x58] sm:$0xff]  ;;  %v1217_v19 = vld [vmem:[%s1820_s1 + $0x10] sm:$0xff]  ;;  %v1216_v21 = vld [vmem:[%s1820_s1 + $0x8] sm:$0xff] }
   0x7   :  { %589 = vmatpush.bf16.msra.mxu1 %v1297_v6  ;;  %v1225_v20 = vld [vmem:[%s1820_s1 + $0x50] sm:$0xff]  ;;  %v1224_v22 = vld [vmem:[%s1820_s1 + $0x48] sm:$0xff]  ;;  %v1215_v23 = vld [vmem:[%s1820_s1] sm:$0xff] }
   0x8   :  { %v953_v24 = vld [vmem:[%s1821_s0 + $0x20] sm:$0xf]  ;;  %v1181_v25 = vld [vmem:[%s1821_s0 + $0x28] sm:$0xf0]  ;;  %v1053_v28 = vld [vmem:[%s1821_s0 + $0xf0] sm:$0xf] }
   0x9   :  { %668 = vmatpush.bf16.msra.mxu2 %v1305_v8  ;;  %v933_v26 = vld [vmem:[%s1821_s0] sm:$0xf]  ;;  %v1177_v27 = vld [vmem:[%s1821_s0 + $0x8] sm:$0xf0]  ;;  %v1207_v29 = vld [vmem:[%s1821_s0 + $0xf8] sm:$0xf0]  ;;  %v954_v33 = vor.u32 %v1181_v25, %v953_v24 }
   0xa   :  { %516 = vmatpush.bf16.msra.mxu0 %v1220_v9  ;;  %1236 = vmatpush.bf16.msra.mxu3 %v1220_v9  ;;  %v1223_v30 = vld [vmem:[%s1820_s1 + $0x40] sm:$0xff]  ;;  %v935_v32 = vld [vmem:[%s1821_s0 + $0xc] sm:$0xf0]  ;;  %v934_v34 = vor.u32 %v1177_v27, %v933_v26  ;;  %v1054_v35 = vor.u32 %v1207_v29, %v1053_v28  ;;  %v965_v37 = vld [vmem:[%s1821_s0 + $0x38] sm:$0xf] }
   0xb   :  { %590 = vmatpush.bf16.msra.mxu1 %v1228_v10  ;;  %v1176_v31 = vld [vmem:[%s1821_s0 + $0x4] sm:$0xf]  ;;  %v945_v39 = vld [vmem:[%s1821_s0 + $0x18] sm:$0xf]  ;;  %v1065_v41 = vld [vmem:[%s1821_s0 + $0x108] sm:$0xf] }
   0xc   :  { %v938_v36 = vor.u32 %v1176_v31, %v935_v32  ;;  %v1184_v38 = vld [vmem:[%s1821_s0 + $0x40] sm:$0xf0]  ;;  %v1210_v42 = vld [vmem:[%s1821_s0 + $0x110] sm:$0xf0]  ;;  %v1179_v43 = vld [vmem:[%s1821_s0 + $0x1c] sm:$0xf] }
   0xd   :  { %669 = vmatpush.bf16.msra.mxu2 %v1318_v11  ;;  %v1180_v40 = vld [vmem:[%s1821_s0 + $0x20] sm:$0xf0]  ;;  %v947_v44 = vld [vmem:[%s1821_s0 + $0x24] sm:$0xf0]  ;;  %v966_v45 = vor.u32 %v1184_v38, %v965_v37  ;;  %v1066_v47 = vor.u32 %v1210_v42, %v1065_v41  ;;  %v977_v49 = vld [vmem:[%s1821_s0 + $0x50] sm:$0xf] }
   0xe   :  { %517 = vmatpush.bf16.msra.mxu0 %v1219_v14  ;;  %1237 = vmatpush.bf16.msra.mxu3 %v1219_v14  ;;  %v946_v46 = vor.u32 %v1180_v40, %v945_v39  ;;  %v950_v48 = vor.u32 %v1179_v43, %v947_v44  ;;  %v1187_v50 = vld [vmem:[%s1821_s0 + $0x58] sm:$0xf0]  ;;  %v957_v51 = vld [vmem:[%s1821_s0 + $0x30] sm:$0xf]  ;;  %v1077_v53 = vld [vmem:[%s1821_s0 + $0x120] sm:$0xf] }
   0xf   :  { %591 = vmatpush.bf16.msra.mxu1 %v1227_v15  ;;  %v1183_v52 = vld [vmem:[%s1821_s0 + $0x38] sm:$0xf0]  ;;  %v1213_v54 = vld [vmem:[%s1821_s0 + $0x128] sm:$0xf0]  ;;  %v1182_v55 = vld [vmem:[%s1821_s0 + $0x34] sm:$0xf]  ;;  %v978_v57 = vor.u32 %v1187_v50, %v977_v49 }
  0x10   :  { %1163 = vmatmul.msk.bf16.vlgmr.msra.gmra.mxu2 %vm470_vm1, %v942_v16  ;;  %v959_v56 = vld [vmem:[%s1821_s0 + $0x3c] sm:$0xf0]  ;;  %v958_v58 = vor.u32 %v1183_v52, %v957_v51  ;;  %v1078_v59 = vor.u32 %v1213_v54, %v1077_v53  ;;  %v989_v61 = vld [vmem:[%s1821_s0 + $0x68] sm:$0xf]  ;;  %v1190_v62 = vld [vmem:[%s1821_s0 + $0x70] sm:$0xf0] }
  0x11   :  { %v962_v60 = vor.u32 %v1182_v55, %v959_v56  ;;  %v969_v63 = vld [vmem:[%s1821_s0 + $0x48] sm:$0xf]  ;;  %v1186_v0 = vld [vmem:[%s1821_s0 + $0x50] sm:$0xf0]  ;;  %v1055_v2 = vld [vmem:[%s1821_s0 + $0xfc] sm:$0xf0]  ;;  %v990_v5 = vor.u32 %v1190_v62, %v989_v61 }
  0x12   :  { %518 = vmatpush.bf16.msra.mxu0 %v1218_v17  ;;  %1238 = vmatpush.bf16.msra.mxu3 %v1218_v17  ;;  %v1185_v3 = vld [vmem:[%s1821_s0 + $0x4c] sm:$0xf]  ;;  %v971_v4 = vld [vmem:[%s1821_s0 + $0x54] sm:$0xf0]  ;;  %v1001_v9 = vld [vmem:[%s1821_s0 + $0x80] sm:$0xf] }
  0x13   :  { %592 = vmatpush.bf16.msra.mxu1 %v1226_v18  ;;  %v1189_v12 = vld [vmem:[%s1821_s0 + $0x68] sm:$0xf0]  ;;  %v1067_v14 = vld [vmem:[%s1821_s0 + $0x114] sm:$0xf0]  ;;  %v983_v16 = vld [vmem:[%s1821_s0 + $0x6c] sm:$0xf0] }
  0x14   :  { %v1209_v13 = vld [vmem:[%s1821_s0 + $0x10c] sm:$0xf]  ;;  %v1192_v24 = vld [vmem:[%s1821_s0 + $0x80] sm:$0xf0]  ;;  %v1079_v26 = vld [vmem:[%s1821_s0 + $0x12c] sm:$0xf0] }
  0x15   :  { %v1212_v25 = vld [vmem:[%s1821_s0 + $0x124] sm:$0xf]  ;;  %v1191_v27 = vld [vmem:[%s1821_s0 + $0x7c] sm:$0xf]  ;;  %v995_v28 = vld [vmem:[%s1821_s0 + $0x84] sm:$0xf0] }
  0x16   :  { %519 = vmatpush.bf16.msra.mxu0 %v1217_v19  ;;  %1239 = vmatpush.bf16.msra.mxu3 %v1217_v19  ;;  %v1070_v19 = vor.u32 %v1209_v13, %v1067_v14  ;;  %v1082_v31 = vor.u32 %v1212_v25, %v1079_v26  ;;  %v998_v32 = vor.u32 %v1191_v27, %v995_v28  ;;  %v1073_v37 = vld [vmem:[%s1821_s0 + $0x110] sm:$0xf]  ;;  %v1211_v38 = vld [vmem:[%s1821_s0 + $0x118] sm:$0xf0]  ;;  %v1194_v39 = vld [vmem:[%s1821_s0 + $0x94] sm:$0xf] }
  0x17   :  { %593 = vmatpush.bf16.msra.mxu1 %v1225_v20  ;;  %v1007_v40 = vld [vmem:[%s1821_s0 + $0x9c] sm:$0xf0]  ;;  %v1255_v42 = vmov 0.0   ;;  %v1074_v44 = vor.u32 %v1211_v38, %v1073_v37  ;;  %v1198_v49 = vld [vmem:[%s1821_s0 + $0xb0] sm:$0xf0] }
  0x18   :  { %20 = vst.msk [vmem:[#allocation2] sm:$0xff] %vm19_vm2, %v1255_v42  ;;  %v1085_v50 = vld [vmem:[%s1821_s0 + $0x128] sm:$0xf]  ;;  %v1214_v51 = vld [vmem:[%s1821_s0 + $0x130] sm:$0xf0] }
  0x19   :  { %21 = vst.msk [vmem:[#allocation2 + $0x8] sm:$0xff] %vm19_vm2, %v1255_v42  ;;  %v1197_v52 = vld [vmem:[%s1821_s0 + $0xac] sm:$0xf]  ;;  %v1019_v53 = vld [vmem:[%s1821_s0 + $0xb4] sm:$0xf0]  ;;  %v1086_v56 = vor.u32 %v1214_v51, %v1085_v50 }
  0x1a   :  { %520 = vmatpush.bf16.msra.mxu0 %v1216_v21  ;;  %1240 = vmatpush.bf16.msra.mxu3 %v1216_v21  ;;  %v1013_v21 = vld [vmem:[%s1821_s0 + $0x98] sm:$0xf]  ;;  %22 = vst.msk [vmem:[#allocation2 + $0x10] sm:$0xff] %vm19_vm2, %v1255_v42  ;;  %v1029_v61 = vld [vmem:[%s1821_s0 + $0xc0] sm:$0xf] }
  0x1b   :  { %594 = vmatpush.bf16.msra.mxu1 %v1224_v22  ;;  %23 = vst.msk [vmem:[#allocation2 + $0x18] sm:$0xff] %vm19_vm2, %v1255_v42  ;;  %v1201_v62 = vld [vmem:[%s1821_s0 + $0xc8] sm:$0xf0]  ;;  %v1043_v25 = vld [vmem:[%s1821_s0 + $0xe4] sm:$0xf0] }
  0x1c   :  { %24 = vst.msk [vmem:[#allocation2 + $0x20] sm:$0xff] %vm19_vm2, %v1255_v42 }
  0x1d   :  { %25 = vst.msk [vmem:[#allocation2 + $0x28] sm:$0xff] %vm19_vm2, %v1255_v42 }
  0x1e   :  { %521 = vmatpush.bf16.msra.mxu0 %v1215_v23  ;;  %1241 = vmatpush.bf16.msra.mxu3 %v1215_v23  ;;  %v993_v23 = vld [vmem:[%s1821_s0 + $0x78] sm:$0xf]  ;;  %26 = vst.msk [vmem:[#allocation2 + $0x30] sm:$0xff] %vm19_vm2, %v1255_v42 }
  0x1f   :  { %595 = vmatpush.bf16.msra.mxu1 %v1223_v30  ;;  %27 = vst.msk [vmem:[#allocation2 + $0x38] sm:$0xff] %vm19_vm2, %v1255_v42 }
  0x20   :  { %1164 = vmatmul.msk.bf16.gmra.mxu2 %vm470_vm1, %v954_v33  ;;  %v1025_v33 = vld [vmem:[%s1821_s0 + $0xb0] sm:$0xf]  ;;  %28 = vst.msk [vmem:[#allocation2 + $0x40] sm:$0xff] %vm19_vm2, %v1255_v42 }
  0x21   :  { %522 = vmatmul.bf16.vlgmr.msra.gmra.mxu0 %v934_v34  ;;  %572 = vmatmul.bf16.vlgmr.msra.gmra.mxu3 %v1054_v35  ;;  %v1199_v34 = vld [vmem:[%s1821_s0 + $0xb8] sm:$0xf0]  ;;  %v1005_v35 = vld [vmem:[%s1821_s0 + $0x90] sm:$0xf]  ;;  %29 = vst.msk [vmem:[#allocation2 + $0x48] sm:$0xff] %vm19_vm2, %v1255_v42 }
  0x22   :  { %1242 = vmatpush.bf16.msrb.mxu3 %v1282_v1  ;;  %596 = vmatmul.bf16.vlgmr.msra.gmra.mxu1 %v938_v36  ;;  %v1206_v1 = vld [vmem:[%s1821_s0 + $0xf4] sm:$0xf]  ;;  %v1195_v36 = vld [vmem:[%s1821_s0 + $0x98] sm:$0xf0]  ;;  %v1026_v41 = vor.u32 %v1199_v34, %v1025_v33  ;;  %30 = vst.msk [vmem:[#allocation2 + $0x50] sm:$0xff] %vm19_vm2, %v1255_v42 }
  0x23   :  { %v1006_v43 = vor.u32 %v1195_v36, %v1005_v35  ;;  %31 = vst.msk [vmem:[#allocation2 + $0x58] sm:$0xff] %vm19_vm2, %v1255_v42  ;;  %v48_v37 = vld [vmem:[#allocation2 + $0x10] sm:$0xff] }
  0x24   :  { %32 = vst.msk [vmem:[#allocation2 + $0x60] sm:$0xff] %vm19_vm2, %v1255_v42 }
  0x25   :  { %33 = vst.msk [vmem:[#allocation2 + $0x68] sm:$0xff] %vm19_vm2, %v1255_v42 }
  0x26   :  { %1243 = vmatpush.bf16.msrb.mxu3 %v1297_v6  ;;  %v970_v6 = vor.u32 %v1186_v0, %v969_v63  ;;  %34 = vst.msk [vmem:[#allocation2 + $0x70] sm:$0xff] %vm19_vm2, %v1255_v42  ;;  %v1200_v0 = vld [vmem:[%s1821_s0 + $0xc4] sm:$0xf] }
  0x27   :  { %35 = vst.msk [vmem:[#allocation2 + $0x78] sm:$0xff] %vm19_vm2, %v1255_v42 }
  0x28   :  { %36 = vst.msk [vmem:[#allocation2 + $0x80] sm:$0xff] %vm19_vm2, %v1255_v42 }
  0x29   :  { %37 = vst.msk [vmem:[#allocation2 + $0x88] sm:$0xff] %vm19_vm2, %v1255_v42 }
  0x2a   :  { %1244 = vmatpush.bf16.msrb.mxu3 %v1228_v10  ;;  %v1193_v10 = vld [vmem:[%s1821_s0 + $0x88] sm:$0xf0]  ;;  %38 = vst.msk [vmem:[#allocation2 + $0x90] sm:$0xff] %vm19_vm2, %v1255_v42 }
  0x2b   :  { %v1002_v17 = vor.u32 %v1193_v10, %v1001_v9  ;;  %39 = vst.msk [vmem:[#allocation2 + $0x98] sm:$0xff] %vm19_vm2, %v1255_v42 }
  0x2c   :  { %40 = vst.msk [vmem:[#allocation2 + $0xa0] sm:$0xff] %vm19_vm2, %v1255_v42 }
  0x2d   :  { %41 = vst.msk [vmem:[#allocation2 + $0xa8] sm:$0xff] %vm19_vm2, %v1255_v42 }
  0x2e   :  { %1245 = vmatpush.bf16.msrb.mxu3 %v1227_v15  ;;  %v1188_v15 = vld [vmem:[%s1821_s0 + $0x64] sm:$0xf]  ;;  %42 = vst.msk [vmem:[#allocation2 + $0xb0] sm:$0xff] %vm19_vm2, %v1255_v42 }
  0x2f   :  { %43 = vst.msk [vmem:[#allocation2 + $0xb8] sm:$0xff] %vm19_vm2, %v1255_v42 }
  0x30   :  { %1165 = vmatmul.msk.bf16.gmra.mxu2 %vm470_vm1, %v966_v45  ;;  %v1010_v45 = vor.u32 %v1194_v39, %v1007_v40  ;;  %44 = vst.msk [vmem:[#allocation2 + $0xc0] sm:$0xff] %vm19_vm2, %v1255_v42 }
  0x31   :  { %527 = vmatmul.bf16.gmra.mxu0 %v946_v46  ;;  %577 = vmatmul.bf16.gmra.mxu3 %v1066_v47  ;;  %v1037_v46 = vld [vmem:[%s1821_s0 + $0xc8] sm:$0xf]  ;;  %v1202_v47 = vld [vmem:[%s1821_s0 + $0xd0] sm:$0xf0]  ;;  %45 = vst.msk [vmem:[#allocation2 + $0xc8] sm:$0xff] %vm19_vm2, %v1255_v42 }
  0x32   :  { %1246 = vmatpush.bf16.msrb.mxu3 %v1226_v18  ;;  %601 = vmatmul.bf16.gmra.mxu1 %v950_v48  ;;  %v1017_v48 = vld [vmem:[%s1821_s0 + $0xa8] sm:$0xf]  ;;  %v1038_v54 = vor.u32 %v1202_v47, %v1037_v46 }
  0x33   :  { %v1018_v55 = vor.u32 %v1198_v49, %v1017_v48  ;;  %v49_v49 = vld [vmem:[#allocation2 + $0x18] sm:$0xff] }
  0x36   :  { %1247 = vmatpush.bf16.msrb.mxu3 %v1225_v20  ;;  %v986_v20 = vor.u32 %v1188_v15, %v983_v16  ;;  %v47_v16 = vld [vmem:[#allocation2 + $0x8] sm:$0xff] }
  0x3a   :  { %1248 = vmatpush.bf16.msrb.mxu3 %v1224_v22  ;;  %v1196_v22 = vld [vmem:[%s1821_s0 + $0xa0] sm:$0xf0] }
  0x3b   :  { %v1014_v29 = vor.u32 %v1196_v22, %v1013_v21  ;;  %v1041_v21 = vld [vmem:[%s1821_s0 + $0xd8] sm:$0xf]  ;;  %v1204_v22 = vld [vmem:[%s1821_s0 + $0xe0] sm:$0xf0] }
  0x3e   :  { %1249 = vmatpush.bf16.msrb.mxu3 %v1223_v30  ;;  %v994_v30 = vor.u32 %v1192_v24, %v993_v23  ;;  %v1203_v24 = vld [vmem:[%s1821_s0 + $0xdc] sm:$0xf] }
  0x3f   :  { %v1046_v33 = vor.u32 %v1203_v24, %v1043_v25 }
  0x40   :  { %1166 = vmatmul.msk.bf16.gmra.mxu2 %vm470_vm1, %v978_v57  ;;  %v1022_v57 = vor.u32 %v1197_v52, %v1019_v53 }
  0x41   :  { %532 = vmatmul.bf16.gmra.mxu0 %v958_v58  ;;  %582 = vmatmul.bf16.gmra.mxu3 %v1078_v59  ;;  %v1049_v59 = vld [vmem:[%s1821_s0 + $0xe0] sm:$0xf] }
  0x42   :  { %1250 = vmatpush.bf16.msra.mxu3 %v1299_v7  ;;  %606 = vmatmul.bf16.gmra.mxu1 %v962_v60  ;;  %v1058_v7 = vor.u32 %v1206_v1, %v1055_v2  ;;  %v1205_v60 = vld [vmem:[%s1821_s0 + $0xe8] sm:$0xf0]  ;;  %v1031_v1 = vld [vmem:[%s1821_s0 + $0xcc] sm:$0xf0] }
  0x43   :  { %v1050_v2 = vor.u32 %v1205_v60, %v1049_v59 }
  0x46   :  { %1251 = vmatpush.bf16.msra.mxu3 %v1305_v8  ;;  %v974_v8 = vor.u32 %v1185_v3, %v971_v4  ;;  %v1030_v3 = vor.u32 %v1201_v62, %v1029_v61  ;;  %v50_v61 = vld [vmem:[#allocation2 + $0x20] sm:$0xff] }
  0x4a   :  { %1252 = vmatpush.bf16.msra.mxu3 %v1318_v11  ;;  %v981_v11 = vld [vmem:[%s1821_s0 + $0x60] sm:$0xf] }
  0x4b   :  { %v982_v18 = vor.u32 %v1189_v12, %v981_v11 }
  0x50   :  { %1167 = vmatmul.msk.bf16.gmra.mxu2 %vm470_vm1, %v990_v5  ;;  %v1034_v5 = vor.u32 %v1200_v0, %v1031_v1 }
  0x51   :  { %537 = vmatmul.bf16.gmra.mxu0 %v970_v6  ;;  %646 = vmatmul.bf16.vlgmr.msrb.gmra.mxu3 %v1058_v7 }
  0x52   :  { %611 = vmatmul.bf16.gmra.mxu1 %v974_v8  ;;  %v46_v8 = vld [vmem:[#allocation2] sm:$0xff] }
  0x60   :  { %1168 = vmatmul.msk.bf16.gmra.mxu2 %vm470_vm1, %v1002_v17  ;;  %v1061_v17 = vld [vmem:[%s1821_s0 + $0xf8] sm:$0xf] }
  0x61   :  { %542 = vmatmul.bf16.gmra.mxu0 %v982_v18  ;;  %651 = vmatmul.bf16.gmra.mxu3 %v1070_v19  ;;  %v1208_v18 = vld [vmem:[%s1821_s0 + $0x100] sm:$0xf0]  ;;  %v1622_v19 = vld [vmem:[%s1822_s2] ss:$0 sm:$0xff] }
  0x62   :  { %616 = vmatmul.bf16.gmra.mxu1 %v986_v20  ;;  %v1062_v28 = vor.u32 %v1208_v18, %v1061_v17 }
  0x70   :  { %1169 = vmatmul.msk.bf16.gmra.mxu2 %vm470_vm1, %v1014_v29 }
  0x71   :  { %547 = vmatmul.bf16.gmra.mxu0 %v994_v30  ;;  %656 = vmatmul.bf16.gmra.mxu3 %v1082_v31  ;;  %v1042_v30 = vor.u32 %v1204_v22, %v1041_v21 }
  0x72   :  { %621 = vmatmul.bf16.gmra.mxu1 %v998_v32 }
  0x80   :  { %1170 = vmatmul.msk.bf16.gmra.mxu2 %vm470_vm1, %v1026_v41 }
  0x81   :  { %552 = vmatmul.bf16.gmra.mxu0 %v1006_v43  ;;  %1174 = vmatmul.msk.bf16.vlgmr.msra.gmra.mxu3 %vm470_vm1, %v1074_v44 }
  0x82   :  { %626 = vmatmul.bf16.gmra.mxu1 %v1010_v45 }
  0x90   :  { %1171 = vmatmul.msk.bf16.gmra.mxu2 %vm470_vm1, %v1038_v54 }
  0x91   :  { %557 = vmatmul.bf16.gmra.mxu0 %v1018_v55  ;;  %1175 = vmatmul.msk.bf16.gmra.mxu3 %vm470_vm1, %v1086_v56 }
  0x92   :  { %631 = vmatmul.bf16.gmra.mxu1 %v1022_v57 }
  0x93   :  { %v671_v58 = vpop.f32.mrf.mxu2 }
  0x9b   :  { %v673_v63 = vpop.f32.mrf.mxu2 }
  0x9e   :  { %v523_v4 = vpop.f32.mrf.mxu0 }
  0x9f   :  { %v597_v6 = vpop.f32.mrf.mxu1 }
  0xa0   :  { %v598_v7 = vadd.f32 %v597_v6, %v523_v4  ;;  %1172 = vmatmul.msk.bf16.gmra.mxu2 %vm470_vm1, %v1050_v2 }
  0xa1   :  { %562 = vmatmul.bf16.gmra.mxu0 %v1030_v3 }
  0xa2   :  { %v672_v9 = vadd.f32 %v671_v58, %v598_v7  ;;  %636 = vmatmul.bf16.gmra.mxu1 %v1034_v5 }
  0xa3   :  { %v676_v10 = vpop.f32.mrf.mxu2 }
  0xa4   :  { %v736_v11 = vadd.f32 %v672_v9, %v46_v8  ;;  %v1610_v12 = vpop.f32.mrf.mxu3  ;;  %v51_v9 = vld [vmem:[#allocation2 + $0x28] sm:$0xff] }
  0xa6   :  { %763 = vst.msk [vmem:[#allocation2] sm:$0xff] %vm19_vm2, %v736_v11  ;;  %v525_v13 = vpop.f32.mrf.mxu0 }
  0xa7   :  { %v599_v14 = vpop.f32.mrf.mxu1 }
  0xa8   :  { %v600_v15 = vadd.f32 %v599_v14, %v525_v13 }
  0xaa   :  { %v674_v20 = vadd.f32 %v673_v63, %v600_v15 }
  0xab   :  { %v678_v23 = vpop.f32.mrf.mxu2 }
  0xac   :  { %v737_v26 = vadd.f32 %v674_v20, %v47_v16  ;;  %v1636_v27 = vpop.f32.mrf.mxu3 }
  0xad   :  { %v792_v29 = vld [vmem:[#allocation2] sm:$0xff] }
  0xae   :  { %v822_v31 = vadd.f32 %v1622_v19, %v792_v29  ;;  %764 = vst.msk [vmem:[#allocation2 + $0x8] sm:$0xff] %vm19_vm2, %v737_v26  ;;  %v528_v32 = vpop.f32.mrf.mxu0 }
  0xaf   :  { %v602_v34 = vpop.f32.mrf.mxu1 }
  0xb0   :  { %v848_v35 = vmax.f32 %v822_v31, 0.0  ;;  %v603_v36 = vadd.f32 %v602_v34, %v528_v32  ;;  %1173 = vmatmul.msk.bf16.gmra.mxu2 %vm470_vm1, %v1062_v28 }
  0xb1   :  { %567 = vmatmul.bf16.gmra.mxu0 %v1042_v30 }
  0xb2   :  { %v874_v38 = vpack.c.bf16 %v848_v35, %v848_v35  ;;  %v677_v39 = vadd.f32 %v676_v10, %v603_v36  ;;  %641 = vmatmul.bf16.gmra.mxu1 %v1046_v33 }
  0xb3   :  { %v681_v40 = vpop.f32.mrf.mxu2 }
  0xb4   :  { %901 = vst.msk [vmem:[%s1823_s3] sm:$0xf] %vm900_vm3, %v874_v38  ;;  %v738_v41 = vadd.f32 %v677_v39, %v48_v37  ;;  %v1645_v42 = vpop.f32.mrf.mxu3  ;;  %v53_v37 = vld [vmem:[#allocation2 + $0x38] sm:$0xff] }
  0xb5   :  { %v793_v43 = vld [vmem:[#allocation2 + $0x8] sm:$0xff] }
  0xb6   :  { %v823_v44 = vadd.f32 %v1622_v19, %v793_v43  ;;  %765 = vst.msk [vmem:[#allocation2 + $0x10] sm:$0xff] %vm19_vm2, %v738_v41  ;;  %v530_v45 = vpop.f32.mrf.mxu0 }
  0xb7   :  { %v604_v46 = vpop.f32.mrf.mxu1 }
  0xb8   :  { %v849_v47 = vmax.f32 %v823_v44, 0.0  ;;  %v605_v48 = vadd.f32 %v604_v46, %v530_v45 }
  0xba   :  { %v875_v50 = vpack.c.bf16 %v849_v47, %v849_v47  ;;  %v679_v51 = vadd.f32 %v678_v23, %v605_v48  ;;  %v52_v23 = vld [vmem:[#allocation2 + $0x30] sm:$0xff] }
  0xbb   :  { %v683_v52 = vpop.f32.mrf.mxu2 }
  0xbc   :  { %902 = vst.msk [vmem:[%s1823_s3 + $0x4] sm:$0xf] %vm900_vm3, %v875_v50  ;;  %v739_v53 = vadd.f32 %v679_v51, %v49_v49  ;;  %v1653_v54 = vpop.f32.mrf.mxu3  ;;  %v54_v50 = vld [vmem:[#allocation2 + $0x40] sm:$0xff] }
  0xbd   :  { %v794_v55 = vld [vmem:[#allocation2 + $0x10] sm:$0xff] }
  0xbe   :  { %v824_v56 = vadd.f32 %v1622_v19, %v794_v55  ;;  %766 = vst.msk [vmem:[#allocation2 + $0x18] sm:$0xff] %vm19_vm2, %v739_v53  ;;  %v533_v57 = vpop.f32.mrf.mxu0 }
  0xbf   :  { %v607_v58 = vpop.f32.mrf.mxu1 }
  0xc0   :  { %v850_v59 = vmax.f32 %v824_v56, 0.0  ;;  %v608_v60 = vadd.f32 %v607_v58, %v533_v57 }
  0xc2   :  { %v876_v62 = vpack.c.bf16 %v850_v59, %v850_v59  ;;  %v682_v63 = vadd.f32 %v681_v40, %v608_v60 }
  0xc3   :  { %v686_v0 = vpop.f32.mrf.mxu2 }
  0xc4   :  { %903 = vst.msk [vmem:[%s1823_s3 + $0x8] sm:$0xf] %vm900_vm3, %v876_v62  ;;  %v740_v1 = vadd.f32 %v682_v63, %v50_v61  ;;  %v1661_v2 = vpop.f32.mrf.mxu3  ;;  %v55_v62 = vld [vmem:[#allocation2 + $0x48] sm:$0xff] }
  0xc5   :  { %v795_v3 = vld [vmem:[#allocation2 + $0x18] sm:$0xff] }
  0xc6   :  { %v825_v4 = vadd.f32 %v1622_v19, %v795_v3  ;;  %767 = vst.msk [vmem:[#allocation2 + $0x20] sm:$0xff] %vm19_vm2, %v740_v1  ;;  %v535_v5 = vpop.f32.mrf.mxu0 }
  0xc7   :  { %v609_v6 = vpop.f32.mrf.mxu1 }
  0xc8   :  { %v851_v7 = vmax.f32 %v825_v4, 0.0  ;;  %v610_v8 = vadd.f32 %v609_v6, %v535_v5 }
  0xca   :  { %v877_v10 = vpack.c.bf16 %v851_v7, %v851_v7  ;;  %v684_v11 = vadd.f32 %v683_v52, %v610_v8 }
  0xcb   :  { %v688_v13 = vpop.f32.mrf.mxu2 }
  0xcc   :  { %904 = vst.msk [vmem:[%s1823_s3 + $0xc] sm:$0xf] %vm900_vm3, %v877_v10  ;;  %v741_v14 = vadd.f32 %v684_v11, %v51_v9  ;;  %v1669_v15 = vpop.f32.mrf.mxu3  ;;  %v56_v11 = vld [vmem:[#allocation2 + $0x50] sm:$0xff] }
  0xcd   :  { %v796_v16 = vld [vmem:[#allocation2 + $0x20] sm:$0xff] }
  0xce   :  { %v826_v17 = vadd.f32 %v1622_v19, %v796_v16  ;;  %768 = vst.msk [vmem:[#allocation2 + $0x28] sm:$0xff] %vm19_vm2, %v741_v14  ;;  %v538_v18 = vpop.f32.mrf.mxu0 }
  0xcf   :  { %v612_v20 = vpop.f32.mrf.mxu1 }
  0xd0   :  { %v852_v21 = vmax.f32 %v826_v17, 0.0  ;;  %v613_v22 = vadd.f32 %v612_v20, %v538_v18 }
  0xd2   :  { %v878_v24 = vpack.c.bf16 %v852_v21, %v852_v21  ;;  %v687_v25 = vadd.f32 %v686_v0, %v613_v22 }
  0xd3   :  { %v691_v26 = vpop.f32.mrf.mxu2 }
  0xd4   :  { %905 = vst.msk [vmem:[%s1823_s3 + $0x10] sm:$0xf] %vm900_vm3, %v878_v24  ;;  %v742_v28 = vadd.f32 %v687_v25, %v52_v23  ;;  %v647_v29 = vpop.f32.mrf.mxu3 }
  0xd5   :  { %v797_v30 = vld [vmem:[#allocation2 + $0x28] sm:$0xff]  ;;  %v1678_v31 = vadd.f32 %v647_v29, %v1610_v12 }
  0xd6   :  { %v827_v32 = vadd.f32 %v1622_v19, %v797_v30  ;;  %769 = vst.msk [vmem:[#allocation2 + $0x30] sm:$0xff] %vm19_vm2, %v742_v28  ;;  %v540_v33 = vpop.f32.mrf.mxu0 }
  0xd7   :  { %v614_v34 = vpop.f32.mrf.mxu1 }
  0xd8   :  { %v853_v35 = vmax.f32 %v827_v32, 0.0  ;;  %v615_v36 = vadd.f32 %v614_v34, %v540_v33 }
  0xda   :  { %v879_v38 = vpack.c.bf16 %v853_v35, %v853_v35  ;;  %v689_v39 = vadd.f32 %v688_v13, %v615_v36 }
  0xdb   :  { %v693_v40 = vpop.f32.mrf.mxu2 }
  0xdc   :  { %906 = vst.msk [vmem:[%s1823_s3 + $0x14] sm:$0xf] %vm900_vm3, %v879_v38  ;;  %v743_v41 = vadd.f32 %v689_v39, %v53_v37  ;;  %v649_v12 = vpop.f32.mrf.mxu3 }
  0xdd   :  { %v798_v43 = vld [vmem:[#allocation2 + $0x30] sm:$0xff]  ;;  %v1687_v44 = vadd.f32 %v649_v12, %v1636_v27 }
  0xde   :  { %v828_v45 = vadd.f32 %v1622_v19, %v798_v43  ;;  %770 = vst.msk [vmem:[#allocation2 + $0x38] sm:$0xff] %vm19_vm2, %v743_v41  ;;  %v543_v46 = vpop.f32.mrf.mxu0 }
  0xdf   :  { %v617_v47 = vpop.f32.mrf.mxu1 }
  0xe0   :  { %v854_v48 = vmax.f32 %v828_v45, 0.0  ;;  %v618_v49 = vadd.f32 %v617_v47, %v543_v46  ;;  %v68_v47 = vld [vmem:[#allocation2 + $0xb0] sm:$0xff] }
  0xe2   :  { %v880_v51 = vpack.c.bf16 %v854_v48, %v854_v48  ;;  %v692_v52 = vadd.f32 %v691_v26, %v618_v49  ;;  %v57_v26 = vld [vmem:[#allocation2 + $0x58] sm:$0xff] }
  0xe3   :  { %v696_v53 = vpop.f32.mrf.mxu2 }
  0xe4   :  { %907 = vst.msk [vmem:[%s1823_s3 + $0x18] sm:$0xf] %vm900_vm3, %v880_v51  ;;  %v744_v55 = vadd.f32 %v692_v52, %v54_v50  ;;  %v652_v27 = vpop.f32.mrf.mxu3 }
  0xe5   :  { %v799_v56 = vld [vmem:[#allocation2 + $0x38] sm:$0xff]  ;;  %v653_v43 = vadd.f32 %v652_v27, %v1645_v42  ;;  %v59_v27 = vld [vmem:[#allocation2 + $0x68] sm:$0xff] }
  0xe6   :  { %v829_v57 = vadd.f32 %v1622_v19, %v799_v56  ;;  %771 = vst.msk [vmem:[#allocation2 + $0x40] sm:$0xff] %vm19_vm2, %v744_v55  ;;  %v545_v58 = vpop.f32.mrf.mxu0 }
  0xe7   :  { %v619_v59 = vpop.f32.mrf.mxu1 }
  0xe8   :  { %v855_v60 = vmax.f32 %v829_v57, 0.0  ;;  %v620_v61 = vadd.f32 %v619_v59, %v545_v58 }
  0xea   :  { %v881_v63 = vpack.c.bf16 %v855_v60, %v855_v60  ;;  %v694_v0 = vadd.f32 %v693_v40, %v620_v61  ;;  %v58_v40 = vld [vmem:[#allocation2 + $0x60] sm:$0xff] }
  0xeb   :  { %v698_v1 = vpop.f32.mrf.mxu2 }
  0xec   :  { %908 = vst.msk [vmem:[%s1823_s3 + $0x1c] sm:$0xf] %vm900_vm3, %v881_v63  ;;  %v745_v3 = vadd.f32 %v694_v0, %v55_v62  ;;  %v654_v4 = vpop.f32.mrf.mxu3  ;;  %v69_v62 = vld [vmem:[#allocation2 + $0xb8] sm:$0xff] }
  0xed   :  { %v800_v5 = vld [vmem:[#allocation2 + $0x40] sm:$0xff]  ;;  %v655_v59 = vadd.f32 %v654_v4, %v1653_v54 }
  0xee   :  { %v830_v6 = vadd.f32 %v1622_v19, %v800_v5  ;;  %772 = vst.msk [vmem:[#allocation2 + $0x48] sm:$0xff] %vm19_vm2, %v745_v3  ;;  %v548_v7 = vpop.f32.mrf.mxu0 }
  0xef   :  { %v622_v8 = vpop.f32.mrf.mxu1 }
  0xf0   :  { %v856_v9 = vmax.f32 %v830_v6, 0.0  ;;  %v623_v10 = vadd.f32 %v622_v8, %v548_v7 }
  0xf2   :  { %v882_v13 = vpack.c.bf16 %v856_v9, %v856_v9  ;;  %v697_v14 = vadd.f32 %v696_v53, %v623_v10  ;;  %v60_v10 = vld [vmem:[#allocation2 + $0x70] sm:$0xff] }
  0xf3   :  { %v701_v16 = vpop.f32.mrf.mxu2 }
  0xf4   :  { %909 = vst.msk [vmem:[%s1823_s3 + $0x20] sm:$0xf] %vm900_vm3, %v882_v13  ;;  %v746_v17 = vadd.f32 %v697_v14, %v56_v11  ;;  %v1707_v18 = vpop.f32.mrf.mxu3 }
  0xf5   :  { %v801_v20 = vld [vmem:[#allocation2 + $0x48] sm:$0xff]  ;;  %v658_v14 = vadd.f32 %v1707_v18, %v1661_v2 }
  0xf6   :  { %v831_v21 = vadd.f32 %v1622_v19, %v801_v20  ;;  %773 = vst.msk [vmem:[#allocation2 + $0x50] sm:$0xff] %vm19_vm2, %v746_v17  ;;  %v550_v22 = vpop.f32.mrf.mxu0 }
  0xf7   :  { %v624_v23 = vpop.f32.mrf.mxu1 }
  0xf8   :  { %v857_v24 = vmax.f32 %v831_v21, 0.0  ;;  %v625_v25 = vadd.f32 %v624_v23, %v550_v22  ;;  %v70_v21 = vld [vmem:[#allocation2 + $0xc0] sm:$0xff] }
  0xfa   :  { %v883_v28 = vpack.c.bf16 %v857_v24, %v857_v24  ;;  %v699_v29 = vadd.f32 %v698_v1, %v625_v25 }
  0xfb   :  { %v703_v30 = vpop.f32.mrf.mxu2 }
  0xfc   :  { %910 = vst.msk [vmem:[%s1823_s3 + $0x24] sm:$0xf] %vm900_vm3, %v883_v28  ;;  %v747_v32 = vadd.f32 %v699_v29, %v57_v26  ;;  %v1715_v33 = vpop.f32.mrf.mxu3 }
  0xfd   :  { %v802_v34 = vld [vmem:[#allocation2 + $0x50] sm:$0xff] }
  0xfe   :  { %v832_v35 = vadd.f32 %v1622_v19, %v802_v34  ;;  %774 = vst.msk [vmem:[#allocation2 + $0x58] sm:$0xff] %vm19_vm2, %v747_v32  ;;  %v553_v36 = vpop.f32.mrf.mxu0 }
  0xff   :  { %v627_v37 = vpop.f32.mrf.mxu1 }
 0x100   :  { %v858_v38 = vmax.f32 %v832_v35, 0.0  ;;  %v628_v39 = vadd.f32 %v627_v37, %v553_v36  ;;  %v61_v35 = vld [vmem:[#allocation2 + $0x78] sm:$0xff] }
 0x102   :  { %v884_v41 = vpack.c.bf16 %v858_v38, %v858_v38  ;;  %v702_v12 = vadd.f32 %v701_v16, %v628_v39  ;;  %v660_v38 = vadd.f32 %v1715_v33, %v1669_v15 }
 0x103   :  { %v706_v45 = vpop.f32.mrf.mxu2 }
 0x104   :  { %911 = vst.msk [vmem:[%s1823_s3 + $0x28] sm:$0xf] %vm900_vm3, %v884_v41  ;;  %v748_v46 = vadd.f32 %v702_v12, %v58_v40  ;;  %v726_v48 = vpop.f32.mrf.mxu3  ;;  %v71_v12 = vld [vmem:[#allocation2 + $0xc8] sm:$0xff] }
 0x105   :  { %v803_v49 = vld [vmem:[#allocation2 + $0x58] sm:$0xff]  ;;  %v727_v50 = vadd.f32 %v726_v48, %v653_v43 }
 0x106   :  { %v833_v51 = vadd.f32 %v1622_v19, %v803_v49  ;;  %775 = vst.msk [vmem:[#allocation2 + $0x60] sm:$0xff] %vm19_vm2, %v748_v46  ;;  %v555_v52 = vpop.f32.mrf.mxu0 }
 0x107   :  { %v758_v53 = vadd.f32 %v727_v50, %v68_v47  ;;  %v629_v55 = vpop.f32.mrf.mxu1 }
 0x108   :  { %v859_v56 = vmax.f32 %v833_v51, 0.0  ;;  %v630_v42 = vadd.f32 %v629_v55, %v555_v52  ;;  %v62_v55 = vld [vmem:[#allocation2 + $0x80] sm:$0xff] }
 0x109   :  { %785 = vst.msk [vmem:[#allocation2 + $0xb0] sm:$0xff] %vm19_vm2, %v758_v53 }
 0x10a   :  { %v885_v57 = vpack.c.bf16 %v859_v56, %v859_v56  ;;  %v704_v58 = vadd.f32 %v703_v30, %v630_v42 }
 0x10b   :  { %v708_v60 = vpop.f32.mrf.mxu2 }
 0x10c   :  { %912 = vst.msk [vmem:[%s1823_s3 + $0x2c] sm:$0xf] %vm900_vm3, %v885_v57  ;;  %v749_v61 = vadd.f32 %v704_v58, %v59_v27  ;;  %v728_v63 = vpop.f32.mrf.mxu3 }
 0x10d   :  { %v804_v0 = vld [vmem:[#allocation2 + $0x60] sm:$0xff]  ;;  %v729_v1 = vadd.f32 %v728_v63, %v655_v59 }
 0x10e   :  { %v834_v3 = vadd.f32 %v1622_v19, %v804_v0  ;;  %776 = vst.msk [vmem:[#allocation2 + $0x68] sm:$0xff] %vm19_vm2, %v749_v61  ;;  %v558_v5 = vpop.f32.mrf.mxu0 }
 0x10f   :  { %v759_v6 = vadd.f32 %v729_v1, %v69_v62  ;;  %v632_v7 = vpop.f32.mrf.mxu1 }
 0x110   :  { %v860_v8 = vmax.f32 %v834_v3, 0.0  ;;  %v814_v54 = vld [vmem:[#allocation2 + $0xb0] sm:$0xff]  ;;  %v633_v4 = vadd.f32 %v632_v7, %v558_v5 }
 0x111   :  { %v844_v9 = vadd.f32 %v1622_v19, %v814_v54  ;;  %786 = vst.msk [vmem:[#allocation2 + $0xb8] sm:$0xff] %vm19_vm2, %v759_v6  ;;  %v63_v6 = vld [vmem:[#allocation2 + $0x88] sm:$0xff] }
 0x112   :  { %v886_v11 = vpack.c.bf16 %v860_v8, %v860_v8  ;;  %v707_v13 = vadd.f32 %v706_v45, %v633_v4 }
 0x113   :  { %v870_v16 = vmax.f32 %v844_v9, 0.0  ;;  %v711_v17 = vpop.f32.mrf.mxu2 }
 0x114   :  { %913 = vst.msk [vmem:[%s1823_s3 + $0x30] sm:$0xf] %vm900_vm3, %v886_v11  ;;  %v750_v20 = vadd.f32 %v707_v13, %v60_v10  ;;  %v731_v22 = vpop.f32.mrf.mxu3 }
 0x115   :  { %v896_v23 = vpack.c.bf16 %v870_v16, %v870_v16  ;;  %v805_v24 = vld [vmem:[#allocation2 + $0x68] sm:$0xff]  ;;  %v732_v25 = vadd.f32 %v731_v22, %v658_v14 }
 0x116   :  { %v835_v26 = vadd.f32 %v1622_v19, %v805_v24  ;;  %777 = vst.msk [vmem:[#allocation2 + $0x70] sm:$0xff] %vm19_vm2, %v750_v20  ;;  %v560_v28 = vpop.f32.mrf.mxu0  ;;  %v66_v24 = vld [vmem:[#allocation2 + $0xa0] sm:$0xff] }
 0x117   :  { %923 = vst.msk [vmem:[%s1823_s3 + $0x58] sm:$0xf] %vm900_vm3, %v896_v23  ;;  %v760_v2 = vadd.f32 %v732_v25, %v70_v21  ;;  %v634_v18 = vpop.f32.mrf.mxu1  ;;  %v64_v21 = vld [vmem:[#allocation2 + $0x90] sm:$0xff] }
 0x118   :  { %v861_v29 = vmax.f32 %v835_v26, 0.0  ;;  %v815_v30 = vld [vmem:[#allocation2 + $0xb8] sm:$0xff]  ;;  %v635_v32 = vadd.f32 %v634_v18, %v560_v28 }
 0x119   :  { %v845_v34 = vadd.f32 %v1622_v19, %v815_v30  ;;  %787 = vst.msk [vmem:[#allocation2 + $0xc0] sm:$0xff] %vm19_vm2, %v760_v2 }
 0x11a   :  { %v887_v36 = vpack.c.bf16 %v861_v29, %v861_v29  ;;  %v709_v37 = vadd.f32 %v708_v60, %v635_v32 }
 0x11b   :  { %v871_v39 = vmax.f32 %v845_v34, 0.0  ;;  %v713_v40 = vpop.f32.mrf.mxu2 }
 0x11c   :  { %914 = vst.msk [vmem:[%s1823_s3 + $0x34] sm:$0xf] %vm900_vm3, %v887_v36  ;;  %v751_v41 = vadd.f32 %v709_v37, %v61_v35  ;;  %v733_v43 = vpop.f32.mrf.mxu3  ;;  %v65_v36 = vld [vmem:[#allocation2 + $0x98] sm:$0xff] }
 0x11d   :  { %v897_v45 = vpack.c.bf16 %v871_v39, %v871_v39  ;;  %v806_v46 = vld [vmem:[#allocation2 + $0x70] sm:$0xff]  ;;  %v734_v47 = vadd.f32 %v733_v43, %v660_v38  ;;  %v67_v39 = vld [vmem:[#allocation2 + $0xa8] sm:$0xff] }
 0x11e   :  { %v836_v48 = vadd.f32 %v1622_v19, %v806_v46  ;;  %778 = vst.msk [vmem:[#allocation2 + $0x78] sm:$0xff] %vm19_vm2, %v751_v41  ;;  %v563_v49 = vpop.f32.mrf.mxu0 }
 0x11f   :  { %924 = vst.msk [vmem:[%s1823_s3 + $0x5c] sm:$0xf] %vm900_vm3, %v897_v45  ;;  %v761_v15 = vadd.f32 %v734_v47, %v71_v12  ;;  %v637_v33 = vpop.f32.mrf.mxu1 }
 0x120   :  { %v862_v50 = vmax.f32 %v836_v48, 0.0  ;;  %v816_v51 = vld [vmem:[#allocation2 + $0xc0] sm:$0xff]  ;;  %v638_v52 = vadd.f32 %v637_v33, %v563_v49 }
 0x121   :  { %v846_v53 = vadd.f32 %v1622_v19, %v816_v51  ;;  %788 = vst.msk [vmem:[#allocation2 + $0xc8] sm:$0xff] %vm19_vm2, %v761_v15 }
 0x122   :  { %v888_v56 = vpack.c.bf16 %v862_v50, %v862_v50  ;;  %v712_v42 = vadd.f32 %v711_v17, %v638_v52 }
 0x123   :  { %v872_v27 = vmax.f32 %v846_v53, 0.0  ;;  %v716_v57 = vpop.f32.mrf.mxu2 }
 0x124   :  { %915 = vst.msk [vmem:[%s1823_s3 + $0x38] sm:$0xf] %vm900_vm3, %v888_v56  ;;  %v752_v58 = vadd.f32 %v712_v42, %v62_v55 }
 0x125   :  { %v898_v59 = vpack.c.bf16 %v872_v27, %v872_v27  ;;  %v807_v60 = vld [vmem:[#allocation2 + $0x78] sm:$0xff] }
 0x126   :  { %v837_v61 = vadd.f32 %v1622_v19, %v807_v60  ;;  %779 = vst.msk [vmem:[#allocation2 + $0x80] sm:$0xff] %vm19_vm2, %v752_v58  ;;  %v565_v62 = vpop.f32.mrf.mxu0 }
 0x127   :  { %925 = vst.msk [vmem:[%s1823_s3 + $0x60] sm:$0xf] %vm900_vm3, %v898_v59  ;;  %v639_v63 = vpop.f32.mrf.mxu1 }
 0x128   :  { %v863_v0 = vmax.f32 %v837_v61, 0.0  ;;  %v817_v1 = vld [vmem:[#allocation2 + $0xc8] sm:$0xff]  ;;  %v640_v3 = vadd.f32 %v639_v63, %v565_v62 }
 0x129   :  { %v847_v5 = vadd.f32 %v1622_v19, %v817_v1 }
 0x12a   :  { %v889_v7 = vpack.c.bf16 %v863_v0, %v863_v0  ;;  %v714_v8 = vadd.f32 %v713_v40, %v640_v3 }
 0x12b   :  { %v873_v54 = vmax.f32 %v847_v5, 0.0  ;;  %v718_v4 = vpop.f32.mrf.mxu2 }
 0x12c   :  { %916 = vst.msk [vmem:[%s1823_s3 + $0x3c] sm:$0xf] %vm900_vm3, %v889_v7  ;;  %v753_v9 = vadd.f32 %v714_v8, %v63_v6 }
 0x12d   :  { %v899_v10 = vpack.c.bf16 %v873_v54, %v873_v54  ;;  %v808_v11 = vld [vmem:[#allocation2 + $0x80] sm:$0xff] }
 0x12e   :  { %v838_v13 = vadd.f32 %v1622_v19, %v808_v11  ;;  %780 = vst.msk [vmem:[#allocation2 + $0x88] sm:$0xff] %vm19_vm2, %v753_v9  ;;  %v568_v14 = vpop.f32.mrf.mxu0 }
 0x12f   :  { %926 = vst.msk [vmem:[%s1823_s3 + $0x64] sm:$0xf] %vm900_vm3, %v899_v10  ;;  %v642_v16 = vpop.f32.mrf.mxu1 }
 0x130   :  { %v864_v17 = vmax.f32 %v838_v13, 0.0  ;;  %v643_v20 = vadd.f32 %v642_v16, %v568_v14 }
 0x132   :  { %v890_v22 = vpack.c.bf16 %v864_v17, %v864_v17  ;;  %v717_v23 = vadd.f32 %v716_v57, %v643_v20 }
 0x133   :  { %v721_v25 = vpop.f32.mrf.mxu2 }
 0x134   :  { %917 = vst.msk [vmem:[%s1823_s3 + $0x40] sm:$0xf] %vm900_vm3, %v890_v22  ;;  %v754_v26 = vadd.f32 %v717_v23, %v64_v21  ;;  %v722_v28 = vadd.f32 %v721_v25, %v1678_v31 }
 0x135   :  { %v809_v2 = vld [vmem:[#allocation2 + $0x88] sm:$0xff] }
 0x136   :  { %v839_v18 = vadd.f32 %v1622_v19, %v809_v2  ;;  %781 = vst.msk [vmem:[#allocation2 + $0x90] sm:$0xff] %vm19_vm2, %v754_v26  ;;  %v756_v29 = vadd.f32 %v722_v28, %v66_v24  ;;  %v570_v30 = vpop.f32.mrf.mxu0 }
 0x137   :  { %v644_v32 = vpop.f32.mrf.mxu1 }
 0x138   :  { %v865_v34 = vmax.f32 %v839_v18, 0.0  ;;  %783 = vst.msk [vmem:[#allocation2 + $0xa0] sm:$0xff] %vm19_vm2, %v756_v29  ;;  %v645_v35 = vadd.f32 %v644_v32, %v570_v30 }
 0x13a   :  { %v891_v37 = vpack.c.bf16 %v865_v34, %v865_v34  ;;  %v719_v38 = vadd.f32 %v718_v4, %v645_v35 }
 0x13b   :  { %v723_v40 = vpop.f32.mrf.mxu2 }
 0x13c   :  { %918 = vst.msk [vmem:[%s1823_s3 + $0x44] sm:$0xf] %vm900_vm3, %v891_v37  ;;  %v755_v31 = vadd.f32 %v719_v38, %v65_v36  ;;  %v724_v41 = vadd.f32 %v723_v40, %v1687_v44 }
 0x13d   :  { %v810_v12 = vld [vmem:[#allocation2 + $0x90] sm:$0xff] }
 0x13e   :  { %v840_v43 = vadd.f32 %v1622_v19, %v810_v12  ;;  %782 = vst.msk [vmem:[#allocation2 + $0x98] sm:$0xff] %vm19_vm2, %v755_v31  ;;  %v757_v45 = vadd.f32 %v724_v41, %v67_v39 }
 0x13f   :  { %v812_v46 = vld [vmem:[#allocation2 + $0xa0] sm:$0xff] }
 0x140   :  { %v866_v47 = vmax.f32 %v840_v43, 0.0  ;;  %v842_v48 = vadd.f32 %v1622_v19, %v812_v46  ;;  %784 = vst.msk [vmem:[#allocation2 + $0xa8] sm:$0xff] %vm19_vm2, %v757_v45 }
 0x142   :  { %v892_v49 = vpack.c.bf16 %v866_v47, %v866_v47  ;;  %v868_v15 = vmax.f32 %v842_v48, 0.0 }
 0x144   :  { %919 = vst.msk [vmem:[%s1823_s3 + $0x48] sm:$0xf] %vm900_vm3, %v892_v49  ;;  %v894_v44 = vpack.c.bf16 %v868_v15, %v868_v15 }
 0x145   :  { %v811_v33 = vld [vmem:[#allocation2 + $0x98] sm:$0xff] }
 0x146   :  { %921 = vst.msk [vmem:[%s1823_s3 + $0x50] sm:$0xf] %vm900_vm3, %v894_v44  ;;  %v841_v50 = vadd.f32 %v1622_v19, %v811_v33 }
 0x147   :  { %v813_v51 = vld [vmem:[#allocation2 + $0xa8] sm:$0xff] }
 0x148   :  { %v867_v52 = vmax.f32 %v841_v50, 0.0  ;;  %v843_v53 = vadd.f32 %v1622_v19, %v813_v51 }
 0x14a   :  { %v893_v55 = vpack.c.bf16 %v867_v52, %v867_v52  ;;  %v869_v56 = vmax.f32 %v843_v53, 0.0 }
 0x14c   :  { %920 = vst.msk [vmem:[%s1823_s3 + $0x4c] sm:$0xf] %vm900_vm3, %v893_v55  ;;  %v895_v42 = vpack.c.bf16 %v869_v56, %v869_v56 }
 0x14e   :  { %922 = vst.msk [vmem:[%s1823_s3 + $0x54] sm:$0xf] %vm900_vm3, %v895_v42 }

</bundles_post_ra>
